<compile_context>
chip_gen: v7x
topology: tpu7x:2x2x1
jax: 0.10.0
libtpu: 0.0.40
codegen_flags: <defaults>
</compile_context>

<pallas_src>
import math
import jax
import jax.numpy as jnp
from jax import lax
from jax.experimental import pallas as pl
from jax.experimental.pallas import tpu as pltpu  # noqa: F401  (not needed at this size)

# ---------------- model hyperparameters (small, deterministic) ----------------
B = 2          # batch
S = 8          # sequence length
D_MODEL = 32   # model dim
N_HEADS = 4
D_K = D_MODEL // N_HEADS


# ------------------------------- fused MHA kernel ------------------------------
def _make_mha_kernel(Bq, Sq, Sk, H, dk, *, self_attn, has_mask):
    """Build a fused multi-head-attention kernel for fixed (static) shapes."""
    Dm = H * dk
    scale = 1.0 / math.sqrt(dk)
    # contract last dim of lhs with last dim of rhs == q @ k^T, no transpose op.
    dn_qkT = (((1,), (1,)), ((), ()))

    def kernel(*refs):
        it = iter(refs)
        if self_attn:
            x_ref = next(it)
        else:
            xq_ref, xk_ref, xv_ref = next(it), next(it), next(it)
        wqkv_ref, bqkv_ref, wo_ref, bo_ref = next(it), next(it), next(it), next(it)
        amask_ref = next(it) if has_mask else None
        o_ref = next(it)

        # ---- projections ----
        if self_attn:
            # One lane-dense (Bq*Sq, 3*Dm) MXU pass + one bias add.
            qkv = jnp.dot(x_ref[...], wqkv_ref[...],
                          preferred_element_type=jnp.float32) + bqkv_ref[...]

            def q_tile(rows, h):
                return qkv[rows, h * dk:(h + 1) * dk]

            def k_tile(rows, h):
                return qkv[rows, Dm + h * dk:Dm + (h + 1) * dk]

            def v_tile(rows, h):
                return qkv[rows, 2 * Dm + h * dk:2 * Dm + (h + 1) * dk]
        else:
            # General cross-attention path: slice the *ref* (zero-cost static
            # window loads), not a loaded value.
            q = jnp.dot(xq_ref[...], wqkv_ref[:, 0:Dm],
                        preferred_element_type=jnp.float32) + bqkv_ref[:, 0:Dm]
            k = jnp.dot(xk_ref[...], wqkv_ref[:, Dm:2 * Dm],
                        preferred_element_type=jnp.float32) + bqkv_ref[:, Dm:2 * Dm]
            v = jnp.dot(xv_ref[...], wqkv_ref[:, 2 * Dm:3 * Dm],
                        preferred_element_type=jnp.float32) + bqkv_ref[:, 2 * Dm:3 * Dm]

            def q_tile(rows, h):
                return q[rows, h * dk:(h + 1) * dk]

            def k_tile(rows, h):
                return k[rows, h * dk:(h + 1) * dk]

            def v_tile(rows, h):
                return v[rows, h * dk:(h + 1) * dk]

        if has_mask:
            am = amask_ref[...]                   # (Bq*Sq, Sk) additive 0 / -1e9

        # ---- scores for every (b, h) tile, stacked along the sublane axis ----
        s_tiles = []
        for b in range(Bq):
            q_rows = slice(b * Sq, (b + 1) * Sq)
            kv_rows = slice(b * Sk, (b + 1) * Sk)
            for h in range(H):
                s = lax.dot_general(q_tile(q_rows, h), k_tile(kv_rows, h), dn_qkT,
                                    preferred_element_type=jnp.float32) * scale
                if has_mask:
                    s = s + am[q_rows, :]
                s_tiles.append(s)                 # (Sq, Sk)
        s_all = jnp.concatenate(s_tiles, axis=0)  # (Bq*H*Sq, Sk)

        # ---- single softmax over all tiles (1 reduce chain, 1 EUP burst) ----
        s_all = s_all - jnp.max(s_all, axis=-1, keepdims=True)
        e = jnp.exp(s_all)
        p_all = e / jnp.sum(e, axis=-1, keepdims=True)   # exact: parity w/ torch

        # ---- per-head (p @ v) folded straight into the output projection ----
        out_rows = []
        for b in range(Bq):
            kv_rows = slice(b * Sk, (b + 1) * Sk)
            acc = jnp.zeros((Sq, Dm), jnp.float32)
            for h in range(H):
                t = b * H + h
                ph = p_all[t * Sq:(t + 1) * Sq, :]                        # (Sq, Sk)
                oh = jnp.dot(ph, v_tile(kv_rows, h),
                             preferred_element_type=jnp.float32)          # (Sq, dk)
                # Wo row-slice is sublane-aligned (multiples of dk=8).
                acc = acc + jnp.dot(oh, wo_ref[h * dk:(h + 1) * dk, :],
                                    preferred_element_type=jnp.float32)
            out_rows.append(acc)

        # single full-tile write of the output
        o_ref[...] = jnp.concatenate(out_rows, axis=0) + bo_ref[...]

    return kernel


def multi_head_attention(params, query, key, value, mask=None):
    """query: (B, Sq, D); key/value: (B, Sk, D); mask broadcastable to (B, Sq, Sk)
    with 1 = keep, 0 = masked (matches mask.unsqueeze(1) + masked_fill in torch)."""
    Bq, Sq, Dm = query.shape
    Sk = key.shape[1]
    H, dk = N_HEADS, Dm // N_HEADS
    assert Dm == H * dk

    self_attn = (query is key) and (key is value)
    has_mask = mask is not None

    args = []
    if self_attn:
        args.append(query.reshape(Bq * Sq, Dm))          # single x input
    else:
        args.append(query.reshape(Bq * Sq, Dm))
        args.append(key.reshape(Bq * Sk, Dm))
        args.append(value.reshape(Bq * Sk, Dm))
    args += [params["wqkv"],
             params["bqkv"].reshape(1, 3 * Dm),
             params["wo"],
             params["bo"].reshape(1, Dm)]
    if has_mask:
        keep = jnp.broadcast_to(mask, (Bq, Sq, Sk))
        amask = jnp.where(keep == 0, jnp.float32(-1e9),
                          jnp.float32(0.0)).reshape(Bq * Sq, Sk)
        args.append(amask)

    kern = _make_mha_kernel(Bq, Sq, Sk, H, dk,
                            self_attn=self_attn, has_mask=has_mask)
    # No grid, no BlockSpecs: whole (tiny) arrays resident in VMEM, kernel body
    # runs exactly once — avoids single-trip grid-loop bookkeeping.
    out = pl.pallas_call(
        kern,
        out_shape=jax.ShapeDtypeStruct((Bq * Sq, Dm), jnp.float32),
    )(*args)
    return out.reshape(Bq, Sq, Dm)


# ------------------------------ reference (plain JAX) ---------------------------
def mha_reference(params, query, key, value, mask):
    Bq, Sq, Dm = query.shape
    Sk = key.shape[1]
    H, dk = N_HEADS, Dm // N_HEADS
    hp = lax.Precision.HIGHEST

    def proj(x, w, b):
        return jnp.dot(x, w, precision=hp) + b

    wqkv, bqkv = params["wqkv"], params["bqkv"]
    q = proj(query, wqkv[:, 0:Dm], bqkv[0:Dm])
    k = proj(key, wqkv[:, Dm:2 * Dm], bqkv[Dm:2 * Dm])
    v = proj(value, wqkv[:, 2 * Dm:], bqkv[2 * Dm:])
    q = q.reshape(Bq, Sq, H, dk).transpose(0, 2, 1, 3)
    k = k.reshape(Bq, Sk, H, dk).transpose(0, 2, 1, 3)
    v = v.reshape(Bq, Sk, H, dk).transpose(0, 2, 1, 3)
    s = jnp.einsum("bhqd,bhkd->bhqk", q, k, precision=hp) / math.sqrt(dk)
    keep = jnp.broadcast_to(mask, (Bq, Sq, Sk))[:, None, :, :]
    s = jnp.where(keep == 0, jnp.float32(-1e9), s)
    p = jax.nn.softmax(s, axis=-1)
    o = jnp.einsum("bhqk,bhkd->bhqd", p, v, precision=hp)
    o = o.transpose(0, 2, 1, 3).reshape(Bq, Sq, Dm)
    return proj(o, params["wo"], params["bo"])


# ------------------------------- parameter init --------------------------------
def init_params(key):
    """Four Linear(d_model, d_model) layers; Q/K/V fused into one (D, 3D) weight.
    Weights are stored pre-transposed (in, out) so the kernel computes y = x @ W + b."""
    kq, kk, kv, ko, kb = jax.random.split(key, 5)
    wq = 0.02 * jax.random.normal(kq, (D_MODEL, D_MODEL), jnp.float32)
    wk = 0.02 * jax.random.normal(kk, (D_MODEL, D_MODEL), jnp.float32)
    wv = 0.02 * jax.random.normal(kv, (D_MODEL, D_MODEL), jnp.float32)
    wo = 0.02 * jax.random.normal(ko, (D_MODEL, D_MODEL), jnp.float32)
    b_all = 0.01 * jax.random.normal(kb, (4 * D_MODEL,), jnp.float32)
    return dict(
        wqkv=jnp.concatenate([wq, wk, wv], axis=1),        # (D, 3D)
        bqkv=b_all[:3 * D_MODEL],                          # (3D,)
        wo=wo,                                             # (D, D)
        bo=b_all[3 * D_MODEL:],                            # (D,)
    )


# ------------------------------------ main --------------------------------------
if __name__ == "__main__":
    key = jax.random.PRNGKey(0)
    k_params, k_x = jax.random.split(key, 2)

    params = init_params(k_params)
    x = jax.random.normal(k_x, (B, S, D_MODEL), jnp.float32)

    # Causal mask (1 = attend, 0 = masked), broadcast to (B, S, S).
    mask = jnp.broadcast_to(jnp.tril(jnp.ones((S, S), jnp.float32))[None],
                            (B, S, S))

    # Self-attention: query = key = value (typical use of the module).
    out = multi_head_attention(params, x, x, x, mask)
    out = jax.block_until_ready(out)
    assert out.shape == (B, S, D_MODEL)

    # Sanity check against a plain-JAX HIGHEST-precision reference.  Tighter
    # than before (exact softmax division); remaining slack covers MXU
    # default-precision rounding on f32 operands.
    ref = mha_reference(params, x, x, x, mask)
    assert bool(jnp.all(jnp.isfinite(out)))
    assert bool(jnp.allclose(out, ref, rtol=1e-2, atol=1e-3)), "mismatch vs reference"

    print("KERNEL_OK")
</pallas_src>

<mosaic_0001>
module attributes {stable_mosaic.version = 11 : i64} {
  func.func @kernel(%arg0: memref<16x32xf32, #tpu.memory_space<vmem>>, %arg1: memref<32x96xf32, #tpu.memory_space<vmem>>, %arg2: memref<1x96xf32, #tpu.memory_space<vmem>>, %arg3: memref<32x32xf32, #tpu.memory_space<vmem>>, %arg4: memref<1x32xf32, #tpu.memory_space<vmem>>, %arg5: memref<16x8xf32, #tpu.memory_space<vmem>>, %arg6: memref<16x32xf32, #tpu.memory_space<vmem>>) attributes {dimension_semantics = [], scalar_prefetch = 0 : i64, scratch_operands = 0 : i64, tpu.core_type = #tpu.core_type<tc>} {
    %c0 = arith.constant 0 : index
    %c0_0 = arith.constant 0 : index
    %0 = vector.load %arg0[%c0, %c0_0] : memref<16x32xf32, #tpu.memory_space<vmem>>, vector<16x32xf32>
    %c0_1 = arith.constant 0 : index
    %c0_2 = arith.constant 0 : index
    %1 = vector.load %arg1[%c0_1, %c0_2] : memref<32x96xf32, #tpu.memory_space<vmem>>, vector<32x96xf32>
    %cst = arith.constant dense<0.000000e+00> : vector<16x96xf32>
    %2 = tpu.matmul %0, %1, %cst {dimension_numbers = #tpu.dot_dimension_numbers<[1], [0], [0], [1], [0, 0, 1, 1], [], []>} : vector<16x32xf32>, vector<32x96xf32>, vector<16x96xf32> -> vector<16x96xf32>
    %c0_3 = arith.constant 0 : index
    %c0_4 = arith.constant 0 : index
    %3 = vector.load %arg2[%c0_3, %c0_4] : memref<1x96xf32, #tpu.memory_space<vmem>>, vector<1x96xf32>
    %4 = vector.broadcast %3 : vector<1x96xf32> to vector<16x96xf32>
    %5 = arith.addf %2, %4 : vector<16x96xf32>
    %c0_5 = arith.constant 0 : index
    %c0_6 = arith.constant 0 : index
    %6 = vector.load %arg5[%c0_5, %c0_6] : memref<16x8xf32, #tpu.memory_space<vmem>>, vector<16x8xf32>
    %7 = vector.extract_strided_slice %5 {offsets = [0, 0], sizes = [8, 8], strides = [1, 1]} : vector<16x96xf32> to vector<8x8xf32>
    %8 = vector.extract_strided_slice %5 {offsets = [0, 32], sizes = [8, 8], strides = [1, 1]} : vector<16x96xf32> to vector<8x8xf32>
    %cst_7 = arith.constant dense<0.000000e+00> : vector<8x8xf32>
    %9 = tpu.matmul %7, %8, %cst_7 {dimension_numbers = #tpu.dot_dimension_numbers<[1], [1], [0], [0], [0, 0, 1, 0], [], []>} : vector<8x8xf32>, vector<8x8xf32>, vector<8x8xf32> -> vector<8x8xf32>
    %cst_8 = arith.constant 0.353553385 : f32
    %10 = vector.broadcast %cst_8 : f32 to vector<8x8xf32>
    %11 = arith.mulf %9, %10 : vector<8x8xf32>
    %12 = vector.extract_strided_slice %6 {offsets = [0, 0], sizes = [8, 8], strides = [1, 1]} : vector<16x8xf32> to vector<8x8xf32>
    %13 = arith.addf %11, %12 : vector<8x8xf32>
    %14 = vector.extract_strided_slice %5 {offsets = [0, 8], sizes = [8, 8], strides = [1, 1]} : vector<16x96xf32> to vector<8x8xf32>
    %15 = vector.extract_strided_slice %5 {offsets = [0, 40], sizes = [8, 8], strides = [1, 1]} : vector<16x96xf32> to vector<8x8xf32>
    %cst_9 = arith.constant dense<0.000000e+00> : vector<8x8xf32>
    %16 = tpu.matmul %14, %15, %cst_9 {dimension_numbers = #tpu.dot_dimension_numbers<[1], [1], [0], [0], [0, 0, 1, 0], [], []>} : vector<8x8xf32>, vector<8x8xf32>, vector<8x8xf32> -> vector<8x8xf32>
    %cst_10 = arith.constant 0.353553385 : f32
    %17 = vector.broadcast %cst_10 : f32 to vector<8x8xf32>
    %18 = arith.mulf %16, %17 : vector<8x8xf32>
    %19 = vector.extract_strided_slice %6 {offsets = [0, 0], sizes = [8, 8], strides = [1, 1]} : vector<16x8xf32> to vector<8x8xf32>
    %20 = arith.addf %18, %19 : vector<8x8xf32>
    %21 = vector.extract_strided_slice %5 {offsets = [0, 16], sizes = [8, 8], strides = [1, 1]} : vector<16x96xf32> to vector<8x8xf32>
    %22 = vector.extract_strided_slice %5 {offsets = [0, 48], sizes = [8, 8], strides = [1, 1]} : vector<16x96xf32> to vector<8x8xf32>
    %cst_11 = arith.constant dense<0.000000e+00> : vector<8x8xf32>
    %23 = tpu.matmul %21, %22, %cst_11 {dimension_numbers = #tpu.dot_dimension_numbers<[1], [1], [0], [0], [0, 0, 1, 0], [], []>} : vector<8x8xf32>, vector<8x8xf32>, vector<8x8xf32> -> vector<8x8xf32>
    %cst_12 = arith.constant 0.353553385 : f32
    %24 = vector.broadcast %cst_12 : f32 to vector<8x8xf32>
    %25 = arith.mulf %23, %24 : vector<8x8xf32>
    %26 = vector.extract_strided_slice %6 {offsets = [0, 0], sizes = [8, 8], strides = [1, 1]} : vector<16x8xf32> to vector<8x8xf32>
    %27 = arith.addf %25, %26 : vector<8x8xf32>
    %28 = vector.extract_strided_slice %5 {offsets = [0, 24], sizes = [8, 8], strides = [1, 1]} : vector<16x96xf32> to vector<8x8xf32>
    %29 = vector.extract_strided_slice %5 {offsets = [0, 56], sizes = [8, 8], strides = [1, 1]} : vector<16x96xf32> to vector<8x8xf32>
    %cst_13 = arith.constant dense<0.000000e+00> : vector<8x8xf32>
    %30 = tpu.matmul %28, %29, %cst_13 {dimension_numbers = #tpu.dot_dimension_numbers<[1], [1], [0], [0], [0, 0, 1, 0], [], []>} : vector<8x8xf32>, vector<8x8xf32>, vector<8x8xf32> -> vector<8x8xf32>
    %cst_14 = arith.constant 0.353553385 : f32
    %31 = vector.broadcast %cst_14 : f32 to vector<8x8xf32>
    %32 = arith.mulf %30, %31 : vector<8x8xf32>
    %33 = vector.extract_strided_slice %6 {offsets = [0, 0], sizes = [8, 8], strides = [1, 1]} : vector<16x8xf32> to vector<8x8xf32>
    %34 = arith.addf %32, %33 : vector<8x8xf32>
    %35 = vector.extract_strided_slice %5 {offsets = [8, 0], sizes = [8, 8], strides = [1, 1]} : vector<16x96xf32> to vector<8x8xf32>
    %36 = vector.extract_strided_slice %5 {offsets = [8, 32], sizes = [8, 8], strides = [1, 1]} : vector<16x96xf32> to vector<8x8xf32>
    %cst_15 = arith.constant dense<0.000000e+00> : vector<8x8xf32>
    %37 = tpu.matmul %35, %36, %cst_15 {dimension_numbers = #tpu.dot_dimension_numbers<[1], [1], [0], [0], [0, 0, 1, 0], [], []>} : vector<8x8xf32>, vector<8x8xf32>, vector<8x8xf32> -> vector<8x8xf32>
    %cst_16 = arith.constant 0.353553385 : f32
    %38 = vector.broadcast %cst_16 : f32 to vector<8x8xf32>
    %39 = arith.mulf %37, %38 : vector<8x8xf32>
    %40 = vector.extract_strided_slice %6 {offsets = [8, 0], sizes = [8, 8], strides = [1, 1]} : vector<16x8xf32> to vector<8x8xf32>
    %41 = arith.addf %39, %40 : vector<8x8xf32>
    %42 = vector.extract_strided_slice %5 {offsets = [8, 8], sizes = [8, 8], strides = [1, 1]} : vector<16x96xf32> to vector<8x8xf32>
    %43 = vector.extract_strided_slice %5 {offsets = [8, 40], sizes = [8, 8], strides = [1, 1]} : vector<16x96xf32> to vector<8x8xf32>
    %cst_17 = arith.constant dense<0.000000e+00> : vector<8x8xf32>
    %44 = tpu.matmul %42, %43, %cst_17 {dimension_numbers = #tpu.dot_dimension_numbers<[1], [1], [0], [0], [0, 0, 1, 0], [], []>} : vector<8x8xf32>, vector<8x8xf32>, vector<8x8xf32> -> vector<8x8xf32>
    %cst_18 = arith.constant 0.353553385 : f32
    %45 = vector.broadcast %cst_18 : f32 to vector<8x8xf32>
    %46 = arith.mulf %44, %45 : vector<8x8xf32>
    %47 = vector.extract_strided_slice %6 {offsets = [8, 0], sizes = [8, 8], strides = [1, 1]} : vector<16x8xf32> to vector<8x8xf32>
    %48 = arith.addf %46, %47 : vector<8x8xf32>
    %49 = vector.extract_strided_slice %5 {offsets = [8, 16], sizes = [8, 8], strides = [1, 1]} : vector<16x96xf32> to vector<8x8xf32>
    %50 = vector.extract_strided_slice %5 {offsets = [8, 48], sizes = [8, 8], strides = [1, 1]} : vector<16x96xf32> to vector<8x8xf32>
    %cst_19 = arith.constant dense<0.000000e+00> : vector<8x8xf32>
    %51 = tpu.matmul %49, %50, %cst_19 {dimension_numbers = #tpu.dot_dimension_numbers<[1], [1], [0], [0], [0, 0, 1, 0], [], []>} : vector<8x8xf32>, vector<8x8xf32>, vector<8x8xf32> -> vector<8x8xf32>
    %cst_20 = arith.constant 0.353553385 : f32
    %52 = vector.broadcast %cst_20 : f32 to vector<8x8xf32>
    %53 = arith.mulf %51, %52 : vector<8x8xf32>
    %54 = vector.extract_strided_slice %6 {offsets = [8, 0], sizes = [8, 8], strides = [1, 1]} : vector<16x8xf32> to vector<8x8xf32>
    %55 = arith.addf %53, %54 : vector<8x8xf32>
    %56 = vector.extract_strided_slice %5 {offsets = [8, 24], sizes = [8, 8], strides = [1, 1]} : vector<16x96xf32> to vector<8x8xf32>
    %57 = vector.extract_strided_slice %5 {offsets = [8, 56], sizes = [8, 8], strides = [1, 1]} : vector<16x96xf32> to vector<8x8xf32>
    %cst_21 = arith.constant dense<0.000000e+00> : vector<8x8xf32>
    %58 = tpu.matmul %56, %57, %cst_21 {dimension_numbers = #tpu.dot_dimension_numbers<[1], [1], [0], [0], [0, 0, 1, 0], [], []>} : vector<8x8xf32>, vector<8x8xf32>, vector<8x8xf32> -> vector<8x8xf32>
    %cst_22 = arith.constant 0.353553385 : f32
    %59 = vector.broadcast %cst_22 : f32 to vector<8x8xf32>
    %60 = arith.mulf %58, %59 : vector<8x8xf32>
    %61 = vector.extract_strided_slice %6 {offsets = [8, 0], sizes = [8, 8], strides = [1, 1]} : vector<16x8xf32> to vector<8x8xf32>
    %62 = arith.addf %60, %61 : vector<8x8xf32>
    %63 = tpu.concatenate %13, %20, %27, %34, %41, %48, %55, %62 in 0 : vector<8x8xf32>, vector<8x8xf32>, vector<8x8xf32>, vector<8x8xf32>, vector<8x8xf32>, vector<8x8xf32>, vector<8x8xf32>, vector<8x8xf32> -> vector<64x8xf32>
    %cst_23 = arith.constant dense<0xFF800000> : vector<64xf32>
    %64 = vector.multi_reduction <maximumf>, %63, %cst_23 [1] : vector<64x8xf32> to vector<64xf32>
    %65 = vector.shape_cast %64 : vector<64xf32> to vector<64x1xf32>
    %66 = vector.broadcast %65 : vector<64x1xf32> to vector<64x8xf32>
    %67 = arith.subf %63, %66 : vector<64x8xf32>
    %68 = math.exp %67 : vector<64x8xf32>
    %cst_24 = arith.constant dense<0.000000e+00> : vector<64xf32>
    %69 = vector.multi_reduction <add>, %68, %cst_24 [1] : vector<64x8xf32> to vector<64xf32>
    %70 = vector.shape_cast %69 : vector<64xf32> to vector<64x1xf32>
    %71 = vector.broadcast %70 : vector<64x1xf32> to vector<64x8xf32>
    %72 = arith.divf %68, %71 : vector<64x8xf32>
    %cst_25 = arith.constant 0.000000e+00 : f32
    %73 = vector.broadcast %cst_25 : f32 to vector<8x32xf32>
    %74 = vector.extract_strided_slice %72 {offsets = [0, 0], sizes = [8, 8], strides = [1, 1]} : vector<64x8xf32> to vector<8x8xf32>
    %75 = vector.extract_strided_slice %5 {offsets = [0, 64], sizes = [8, 8], strides = [1, 1]} : vector<16x96xf32> to vector<8x8xf32>
    %cst_26 = arith.constant dense<0.000000e+00> : vector<8x8xf32>
    %76 = tpu.matmul %74, %75, %cst_26 {dimension_numbers = #tpu.dot_dimension_numbers<[1], [0], [0], [1], [0, 0, 1, 1], [], []>} : vector<8x8xf32>, vector<8x8xf32>, vector<8x8xf32> -> vector<8x8xf32>
    %c0_27 = arith.constant 0 : index
    %c0_28 = arith.constant 0 : index
    %77 = vector.load %arg3[%c0_27, %c0_28] : memref<32x32xf32, #tpu.memory_space<vmem>>, vector<8x32xf32>
    %cst_29 = arith.constant dense<0.000000e+00> : vector<8x32xf32>
    %78 = tpu.matmul %76, %77, %cst_29 {dimension_numbers = #tpu.dot_dimension_numbers<[1], [0], [0], [1], [0, 0, 1, 1], [], []>} : vector<8x8xf32>, vector<8x32xf32>, vector<8x32xf32> -> vector<8x32xf32>
    %79 = arith.addf %73, %78 : vector<8x32xf32>
    %80 = vector.extract_strided_slice %72 {offsets = [8, 0], sizes = [8, 8], strides = [1, 1]} : vector<64x8xf32> to vector<8x8xf32>
    %81 = vector.extract_strided_slice %5 {offsets = [0, 72], sizes = [8, 8], strides = [1, 1]} : vector<16x96xf32> to vector<8x8xf32>
    %cst_30 = arith.constant dense<0.000000e+00> : vector<8x8xf32>
    %82 = tpu.matmul %80, %81, %cst_30 {dimension_numbers = #tpu.dot_dimension_numbers<[1], [0], [0], [1], [0, 0, 1, 1], [], []>} : vector<8x8xf32>, vector<8x8xf32>, vector<8x8xf32> -> vector<8x8xf32>
    %c8 = arith.constant 8 : index
    %c0_31 = arith.constant 0 : index
    %83 = vector.load %arg3[%c8, %c0_31] : memref<32x32xf32, #tpu.memory_space<vmem>>, vector<8x32xf32>
    %cst_32 = arith.constant dense<0.000000e+00> : vector<8x32xf32>
    %84 = tpu.matmul %82, %83, %cst_32 {dimension_numbers = #tpu.dot_dimension_numbers<[1], [0], [0], [1], [0, 0, 1, 1], [], []>} : vector<8x8xf32>, vector<8x32xf32>, vector<8x32xf32> -> vector<8x32xf32>
    %85 = arith.addf %79, %84 : vector<8x32xf32>
    %86 = vector.extract_strided_slice %72 {offsets = [16, 0], sizes = [8, 8], strides = [1, 1]} : vector<64x8xf32> to vector<8x8xf32>
    %87 = vector.extract_strided_slice %5 {offsets = [0, 80], sizes = [8, 8], strides = [1, 1]} : vector<16x96xf32> to vector<8x8xf32>
    %cst_33 = arith.constant dense<0.000000e+00> : vector<8x8xf32>
    %88 = tpu.matmul %86, %87, %cst_33 {dimension_numbers = #tpu.dot_dimension_numbers<[1], [0], [0], [1], [0, 0, 1, 1], [], []>} : vector<8x8xf32>, vector<8x8xf32>, vector<8x8xf32> -> vector<8x8xf32>
    %c16 = arith.constant 16 : index
    %c0_34 = arith.constant 0 : index
    %89 = vector.load %arg3[%c16, %c0_34] : memref<32x32xf32, #tpu.memory_space<vmem>>, vector<8x32xf32>
    %cst_35 = arith.constant dense<0.000000e+00> : vector<8x32xf32>
    %90 = tpu.matmul %88, %89, %cst_35 {dimension_numbers = #tpu.dot_dimension_numbers<[1], [0], [0], [1], [0, 0, 1, 1], [], []>} : vector<8x8xf32>, vector<8x32xf32>, vector<8x32xf32> -> vector<8x32xf32>
    %91 = arith.addf %85, %90 : vector<8x32xf32>
    %92 = vector.extract_strided_slice %72 {offsets = [24, 0], sizes = [8, 8], strides = [1, 1]} : vector<64x8xf32> to vector<8x8xf32>
    %93 = vector.extract_strided_slice %5 {offsets = [0, 88], sizes = [8, 8], strides = [1, 1]} : vector<16x96xf32> to vector<8x8xf32>
    %cst_36 = arith.constant dense<0.000000e+00> : vector<8x8xf32>
    %94 = tpu.matmul %92, %93, %cst_36 {dimension_numbers = #tpu.dot_dimension_numbers<[1], [0], [0], [1], [0, 0, 1, 1], [], []>} : vector<8x8xf32>, vector<8x8xf32>, vector<8x8xf32> -> vector<8x8xf32>
    %c24 = arith.constant 24 : index
    %c0_37 = arith.constant 0 : index
    %95 = vector.load %arg3[%c24, %c0_37] : memref<32x32xf32, #tpu.memory_space<vmem>>, vector<8x32xf32>
    %cst_38 = arith.constant dense<0.000000e+00> : vector<8x32xf32>
    %96 = tpu.matmul %94, %95, %cst_38 {dimension_numbers = #tpu.dot_dimension_numbers<[1], [0], [0], [1], [0, 0, 1, 1], [], []>} : vector<8x8xf32>, vector<8x32xf32>, vector<8x32xf32> -> vector<8x32xf32>
    %97 = arith.addf %91, %96 : vector<8x32xf32>
    %cst_39 = arith.constant 0.000000e+00 : f32
    %98 = vector.broadcast %cst_39 : f32 to vector<8x32xf32>
    %99 = vector.extract_strided_slice %72 {offsets = [32, 0], sizes = [8, 8], strides = [1, 1]} : vector<64x8xf32> to vector<8x8xf32>
    %100 = vector.extract_strided_slice %5 {offsets = [8, 64], sizes = [8, 8], strides = [1, 1]} : vector<16x96xf32> to vector<8x8xf32>
    %cst_40 = arith.constant dense<0.000000e+00> : vector<8x8xf32>
    %101 = tpu.matmul %99, %100, %cst_40 {dimension_numbers = #tpu.dot_dimension_numbers<[1], [0], [0], [1], [0, 0, 1, 1], [], []>} : vector<8x8xf32>, vector<8x8xf32>, vector<8x8xf32> -> vector<8x8xf32>
    %c0_41 = arith.constant 0 : index
    %c0_42 = arith.constant 0 : index
    %102 = vector.load %arg3[%c0_41, %c0_42] : memref<32x32xf32, #tpu.memory_space<vmem>>, vector<8x32xf32>
    %cst_43 = arith.constant dense<0.000000e+00> : vector<8x32xf32>
    %103 = tpu.matmul %101, %102, %cst_43 {dimension_numbers = #tpu.dot_dimension_numbers<[1], [0], [0], [1], [0, 0, 1, 1], [], []>} : vector<8x8xf32>, vector<8x32xf32>, vector<8x32xf32> -> vector<8x32xf32>
    %104 = arith.addf %98, %103 : vector<8x32xf32>
    %105 = vector.extract_strided_slice %72 {offsets = [40, 0], sizes = [8, 8], strides = [1, 1]} : vector<64x8xf32> to vector<8x8xf32>
    %106 = vector.extract_strided_slice %5 {offsets = [8, 72], sizes = [8, 8], strides = [1, 1]} : vector<16x96xf32> to vector<8x8xf32>
    %cst_44 = arith.constant dense<0.000000e+00> : vector<8x8xf32>
    %107 = tpu.matmul %105, %106, %cst_44 {dimension_numbers = #tpu.dot_dimension_numbers<[1], [0], [0], [1], [0, 0, 1, 1], [], []>} : vector<8x8xf32>, vector<8x8xf32>, vector<8x8xf32> -> vector<8x8xf32>
    %c8_45 = arith.constant 8 : index
    %c0_46 = arith.constant 0 : index
    %108 = vector.load %arg3[%c8_45, %c0_46] : memref<32x32xf32, #tpu.memory_space<vmem>>, vector<8x32xf32>
    %cst_47 = arith.constant dense<0.000000e+00> : vector<8x32xf32>
    %109 = tpu.matmul %107, %108, %cst_47 {dimension_numbers = #tpu.dot_dimension_numbers<[1], [0], [0], [1], [0, 0, 1, 1], [], []>} : vector<8x8xf32>, vector<8x32xf32>, vector<8x32xf32> -> vector<8x32xf32>
    %110 = arith.addf %104, %109 : vector<8x32xf32>
    %111 = vector.extract_strided_slice %72 {offsets = [48, 0], sizes = [8, 8], strides = [1, 1]} : vector<64x8xf32> to vector<8x8xf32>
    %112 = vector.extract_strided_slice %5 {offsets = [8, 80], sizes = [8, 8], strides = [1, 1]} : vector<16x96xf32> to vector<8x8xf32>
    %cst_48 = arith.constant dense<0.000000e+00> : vector<8x8xf32>
    %113 = tpu.matmul %111, %112, %cst_48 {dimension_numbers = #tpu.dot_dimension_numbers<[1], [0], [0], [1], [0, 0, 1, 1], [], []>} : vector<8x8xf32>, vector<8x8xf32>, vector<8x8xf32> -> vector<8x8xf32>
    %c16_49 = arith.constant 16 : index
    %c0_50 = arith.constant 0 : index
    %114 = vector.load %arg3[%c16_49, %c0_50] : memref<32x32xf32, #tpu.memory_space<vmem>>, vector<8x32xf32>
    %cst_51 = arith.constant dense<0.000000e+00> : vector<8x32xf32>
    %115 = tpu.matmul %113, %114, %cst_51 {dimension_numbers = #tpu.dot_dimension_numbers<[1], [0], [0], [1], [0, 0, 1, 1], [], []>} : vector<8x8xf32>, vector<8x32xf32>, vector<8x32xf32> -> vector<8x32xf32>
    %116 = arith.addf %110, %115 : vector<8x32xf32>
    %117 = vector.extract_strided_slice %72 {offsets = [56, 0], sizes = [8, 8], strides = [1, 1]} : vector<64x8xf32> to vector<8x8xf32>
    %118 = vector.extract_strided_slice %5 {offsets = [8, 88], sizes = [8, 8], strides = [1, 1]} : vector<16x96xf32> to vector<8x8xf32>
    %cst_52 = arith.constant dense<0.000000e+00> : vector<8x8xf32>
    %119 = tpu.matmul %117, %118, %cst_52 {dimension_numbers = #tpu.dot_dimension_numbers<[1], [0], [0], [1], [0, 0, 1, 1], [], []>} : vector<8x8xf32>, vector<8x8xf32>, vector<8x8xf32> -> vector<8x8xf32>
    %c24_53 = arith.constant 24 : index
    %c0_54 = arith.constant 0 : index
    %120 = vector.load %arg3[%c24_53, %c0_54] : memref<32x32xf32, #tpu.memory_space<vmem>>, vector<8x32xf32>
    %cst_55 = arith.constant dense<0.000000e+00> : vector<8x32xf32>
    %121 = tpu.matmul %119, %120, %cst_55 {dimension_numbers = #tpu.dot_dimension_numbers<[1], [0], [0], [1], [0, 0, 1, 1], [], []>} : vector<8x8xf32>, vector<8x32xf32>, vector<8x32xf32> -> vector<8x32xf32>
    %122 = arith.addf %116, %121 : vector<8x32xf32>
    %123 = tpu.concatenate %97, %122 in 0 : vector<8x32xf32>, vector<8x32xf32> -> vector<16x32xf32>
    %c0_56 = arith.constant 0 : index
    %c0_57 = arith.constant 0 : index
    %124 = vector.load %arg4[%c0_56, %c0_57] : memref<1x32xf32, #tpu.memory_space<vmem>>, vector<1x32xf32>
    %125 = vector.broadcast %124 : vector<1x32xf32> to vector<16x32xf32>
    %126 = arith.addf %123, %125 : vector<16x32xf32>
    %c0_58 = arith.constant 0 : index
    %c0_59 = arith.constant 0 : index
    %127 = vector.load %arg6[%c0_58, %c0_59] : memref<16x32xf32, #tpu.memory_space<vmem>>, vector<16x32xf32>
    tpu.vector_store %arg6[%c0_58, %c0_59], %126 {strides = array<i32>} : memref<16x32xf32, #tpu.memory_space<vmem>>, vector<16x32xf32>,
    return
  }
}

</mosaic_0001>

<bundles_post_ra>
// kernel: tpu_custom_call.1
= control target key start
LH: loop header
LB: loop body
LE: loop exit
PB: predicated region body
PF: predicated region fallthrough
CT: control target
= control target key end

     0   :  { %11 = vsyncpa [#allocation3], 0  ;;  %s2784_s0 = inlined_call_operand.hbm [shape: f32[16,32], index: 0, kind: input, shape index: {}]   ;;  %s2785_s1 = inlined_call_operand.hbm [shape: f32[32,96], index: 1, kind: input, shape index: {}]   ;;  %s2786_s2 = inlined_call_operand.vmem [shape: f32[1,96], index: 2, kind: input, shape index: {}]   ;;  %s2787_s3 = inlined_call_operand.vmem [shape: f32[32,32], index: 3, kind: input, shape index: {}]   ;;  %s2788_s4 = inlined_call_operand.vmem [shape: f32[1,32], index: 4, kind: input, shape index: {}]   ;;  %s2789_s5 = inlined_call_operand.vmem [shape: f32[16,8], index: 5, kind: input, shape index: {}]   ;;  %s2790_s6 = inlined_call_operand.hbm [shape: f32[16,32], index: 6, kind: output, shape index: {}]  }
   0x1   :  { %12 = vsyncpa [#allocation6], 0 }
   0x2   :  { %13 = vsyncpa [#allocation4], 0  ;;  %s2456_s21 = smov [#allocation2]   ;;  %s2384_s25 = scalar_lea.hbm %s2784_s0, 256 }
   0x3   :  { %s19_s22 = sshll.u32 %s2456_s21, 4  ;;  %p2385_p0 = scmp.ne.s32.totalorder %s2784_s0, %s2384_s25  ;;  %s20_s22 = int_to_ptr.vmem [resolvable:$true] %s19_s22 }
   0x4   :  { %p2388_p1 = scmp.lt.u32.totalorder %s2384_s25, %s2784_s0 }
   0x6   :  { %p2390_p2 = pnand %p2388_p1, %p2385_p0 }
   0x8   :  { %2393 = shalt.err (!%p2390_p2)
}
   0x9   :  { %s2394_s30 = scalar_lea.vmem %s20_s22, 256  ;;  %p2399_p4 = scmp.lt.s32.totalorder %s20_s22, %s20_s22 }
   0xa   :  { %p2395_p3 = scmp.ne.s32.totalorder %s20_s22, %s2394_s30  ;;  %p2400_p5 = scmp.lt.s32.totalorder %s2394_s30, %s2394_s30 }
   0xc   :  { %p2401_p6 = por %p2400_p5, %p2399_p4 }
   0xe   :  { %p2402_p7 = pnand %p2401_p6, %p2395_p3 }
  0x10   :  { %2405 = shalt.err (!%p2402_p7)
}
  0x11   :  { %s2457_s7 = smov 128   ;;  %s2458_s8 = smov 8  }
  0x12   :  { %25 = dma.hbm_to_vmem [thread:$0]  %s2784_s0, 256, %s20_s22, [#allocation3], %s2457_s7, %s2457_s7, %s2458_s8  }
  0x13   :  { %s2459_s11 = smov [#allocation5]   ;;  %s2406_s15 = scalar_lea.hbm %s2785_s1, 512 }
  0x14   :  { %s31_s12 = sshll.u32 %s2459_s11, 4  ;;  %p2407_p8 = scmp.ne.s32.totalorder %s2785_s1, %s2406_s15  ;;  %s32_s12 = int_to_ptr.vmem [resolvable:$true] %s31_s12 }
  0x15   :  { %p2410_p9 = scmp.lt.u32.totalorder %s2406_s15, %s2785_s1 }
  0x17   :  { %p2412_p10 = pnand %p2410_p9, %p2407_p8 }
  0x19   :  { %2415 = shalt.err (!%p2412_p10)
}
  0x1a   :  { %s2416_s20 = scalar_lea.vmem %s32_s12, 512  ;;  %p2421_p12 = scmp.lt.s32.totalorder %s32_s12, %s32_s12 }
  0x1b   :  { %p2417_p11 = scmp.ne.s32.totalorder %s32_s12, %s2416_s20  ;;  %p2422_p13 = scmp.lt.s32.totalorder %s2416_s20, %s2416_s20 }
  0x1d   :  { %p2423_p0 = por %p2422_p13, %p2421_p12 }
  0x1f   :  { %p2424_p1 = pnand %p2423_p0, %p2417_p11 }
  0x21   :  { %2427 = shalt.err (!%p2424_p1)
}
  0x22   :  { %37 = dma.hbm_to_vmem [thread:$0]  %s2785_s1, 512, %s32_s12, [#allocation6], %s2457_s7, %s2457_s7, %s2458_s8  }
  0x23   :  { %2450 = dma.done.wait [#allocation3], 256  }
  0x24   :  { %2451 = vsyncadd [#allocation3], 4294967040 }
  0x25   :  { %2452 = dma.done.wait [#allocation6], 512  }
  0x26   :  { %2453 = vsyncadd [#allocation6], 4294966784  ;;  %vm65_vm0 = vcmask 261120   ;;  %v54_v0 = vld [vmem:[#allocation5] sm:$0xff]  ;;  %v55_v1 = vld [vmem:[#allocation5 + $0x8] sm:$0xff]  ;;  %v2460_v8 = vmov 0.0  }
  0x27   :  { %v56_v2 = vld [vmem:[#allocation5 + $0x10] sm:$0xff]  ;;  %v2326_v3 = vpack.c.bf16 %v55_v1, %v54_v0  ;;  %v57_v4 = vld [vmem:[#allocation5 + $0x18] sm:$0xff]  ;;  %2206 = vmatprep.subr.mxu1 %v2460_v8  ;;  %vm2461_vm1 = vmmov 0   ;;  %s2462_s23 = smov 120   ;;  %s2463_s24 = smov 96   ;;  %vm152_vm2 = vcmask 64512  }
  0x28   :  { %v52_v5 = vld [vmem:[#allocation2] sm:$0xff]  ;;  %v2330_v6 = vpack.c.bf16 %v57_v4, %v56_v2  ;;  %v53_v7 = vld [vmem:[#allocation2 + $0x8] sm:$0xff]  ;;  %2208 = vmatprep.mubr.msk.f32.mxu1 %vm2461_vm1, %v2460_v8  ;;  %s2464_s25 = smov 80   ;;  %s2465_s26 = smov 88  }
  0x29   :  { %2203 = vmatprep.mubr.msk.f32.mxu0 %vm65_vm0, %v52_v5  ;;  %2327 = vmatprep.subr.bf16.mxu0 %v2326_v3  ;;  %v2105_v9 = vld [vmem:[%s2786_s2] ss:$0 sm:$0xff]  ;;  %s2466_s2 = smov 72   ;;  %s2467_s27 = smov 112  }
  0x2a   :  { %2329 = vmatpush3.bf16.msra.mxu0 %v2326_v3  ;;  %s2468_s28 = smov 104   ;;  %v147_v23 = vld [vmem:[%s2789_s5] sm:$0xff]  ;;  %s2469_s9 = smov 56  }
  0x2b   :  { %2331 = vmatprep.subr.bf16.mxu0 %v2330_v6  ;;  %s2470_s10 = smov 64   ;;  %s2471_s11 = smov 40  }
  0x2c   :  { %s2472_s12 = smov 48  }
  0x2e   :  { %2333 = vmatpush3.bf16.msra.mxu0 %v2330_v6 }
  0x2f   :  { %2216 = vmatprep.subr.mxu0 %v2460_v8 }
  0x31   :  { %2204 = vmatmul.mubr.msk.f32.vlgmr.msra.gmra.mrb[0].mxu0 %vm65_vm0, %v53_v7 }
  0x32   :  { %2218 = vmatprep.mubr.msk.f32.mxu0 %vm2461_vm1, %v2460_v8 }
 0x104   :  { %v2205_v10 = vpop.f32.mrb[0].mxu0 }
 0x105   :  { %v138_v11 = vpop.f32.mrb[1].mxu0  ;;  %v2565_v13 = vadd.f32 %v2205_v10, %v2105_v9 }
 0x106   :  { %v2550_v12 = vadd.f32 %v2105_v9, %v138_v11 }
 0x108   :  { %229 = vrot.lane.b32.xlu1 %v2550_v12, %s2462_s23  ;;  %150 = vrot.lane.b32.xlu0 %v2550_v12, %s2463_s24 }
 0x10c   :  { %311 = vrot.lane.b32.xlu1 %v2550_v12, %s2464_s25  ;;  %231 = vrot.lane.b32.xlu0 %v2550_v12, %s2465_s26 }
 0x110   :  { %391 = vrot.lane.b32.xlu1 %v2550_v12, %s2466_s2  ;;  %309 = vrot.lane.b32.xlu0 %v2550_v12, %s2467_s27 }
 0x114   :  { %389 = vrot.lane.b32.xlu0 %v2550_v12, %s2468_s28 }
 0x118   :  { %550 = vrot.lane.b32.xlu0 %v2565_v13, %s2465_s26 }
 0x17a   :  { %v230_v14 = vpop.permute.xlu1 %229  ;;  %v151_v15 = vpop.permute.xlu0 %150 }
 0x17b   :  { %2207 = vmatpush3.xpose.msk.msra.mxu1 %vm152_vm2, %v151_v15 }
 0x17c   :  { %2211 = vmatprep.subr.mxu1 %v2460_v8 }
 0x17e   :  { %v312_v16 = vpop.permute.xlu1 %311  ;;  %2209 = vmatmul.mubr.msk.f32.vlgmr.msra.gmra.mrb[0].mxu1 %vm152_vm2, %v2550_v12  ;;  %v232_v17 = vpop.permute.xlu0 %231 }
 0x17f   :  { %2212 = vmatpush3.xpose.msk.msra.mxu1 %vm152_vm2, %v232_v17  ;;  %2217 = vmatpush3.xpose.msk.msra.mxu0 %vm152_vm2, %v312_v16 }
 0x180   :  { %2213 = vmatprep.mubr.msk.f32.mxu1 %vm2461_vm1, %v2460_v8  ;;  %2221 = vmatprep.subr.mxu1 %v2460_v8 }
 0x181   :  { %2226 = vmatprep.subr.mxu0 %v2460_v8 }
 0x182   :  { %v392_v18 = vpop.permute.xlu1 %391  ;;  %2214 = vmatmul.mubr.msk.f32.vlgmr.msra.gmra.mrb[2].mxu1 %vm152_vm2, %v230_v14  ;;  %v310_v19 = vpop.permute.xlu0 %309  ;;  %v2654_v14 = vld [vmem:[%s2789_s5 + $0x8] sm:$0xff] }
 0x183   :  { %2219 = vmatmul.mubr.msk.f32.vlgmr.msra.gmra.mrb[2].mxu0 %vm152_vm2, %v310_v19  ;;  %2222 = vmatpush3.xpose.msk.msra.mxu1 %vm152_vm2, %v392_v18 }
 0x184   :  { %2223 = vmatprep.mubr.msk.f32.mxu1 %vm2461_vm1, %v2460_v8  ;;  %2231 = vmatprep.subr.mxu1 %v2460_v8 }
 0x185   :  { %2228 = vmatprep.mubr.msk.f32.mxu0 %vm2461_vm1, %v2460_v8 }
 0x186   :  { %v390_v20 = vpop.permute.xlu0 %389 }
 0x187   :  { %2224 = vmatmul.mubr.msk.f32.vlgmr.msra.gmra.mrb[4].mxu1 %vm152_vm2, %v390_v20 }
 0x188   :  { %2233 = vmatprep.mubr.msk.f32.mxu1 %vm2461_vm1, %v2460_v8 }
 0x18a   :  { %v551_v21 = vpop.permute.xlu0 %550 }
 0x18b   :  { %2232 = vmatpush3.xpose.msk.msra.mxu1 %vm152_vm2, %v551_v21 }
 0x18c   :  { %2241 = vmatprep.subr.mxu1 %v2460_v8 }
 0x251   :  { %v223_v22 = vpop.f32.mrb[0].mxu1 }
 0x252   :  { %v227_v24 = vmul.f32 0.35355338, %v223_v22  ;;  %v2210_v25 = vpop.f32.mrb[1].mxu1 }
 0x254   :  { %v2594_v26 = vadd.f32 %v227_v24, %v147_v23  ;;  %v2669_v24 = vld [vmem:[%s2787_s3 + $0x8] sm:$0xff] }
 0x255   :  { %v303_v27 = vpop.f32.mrb[2].mxu1 }
 0x256   :  { %v307_v28 = vmul.f32 0.35355338, %v303_v27  ;;  %v2215_v29 = vpop.f32.mrb[3].mxu1  ;;  %v383_v30 = vpop.f32.mrb[2].mxu0  ;;  %v788_v52 = vsel %vm152_vm2, %v2594_v26, -inf }
 0x257   :  { %v2220_v31 = vpop.f32.mrb[3].mxu0  ;;  %v387_v38 = vmul.f32 0.35355338, %v383_v30 }
 0x258   :  { %v308_v32 = vadd.f32 %v307_v28, %v147_v23 }
 0x259   :  { %v388_v39 = vadd.f32 %v387_v38, %v147_v23 }
 0x25a   :  { %v463_v33 = vpop.f32.mrb[4].mxu1  ;;  %v791_v34 = vsel %vm152_vm2, %v308_v32, -inf }
 0x25b   :  { %v467_v35 = vmul.f32 0.35355338, %v463_v33  ;;  %792 = vmax.xlane.f32.xlu1 %v791_v34  ;;  %v2225_v36 = vpop.f32.mrb[5].mxu1  ;;  %v794_v40 = vsel %vm152_vm2, %v388_v39, -inf }
 0x25c   :  { %v952_v36 = vld [vmem:[%s2787_s3] sm:$0xff] }
 0x25d   :  { %v2597_v37 = vadd.f32 %v467_v35, %v147_v23 }
 0x25f   :  { %v797_v53 = vsel %vm152_vm2, %v2597_v37, -inf }
 0x26c   :  { %548 = vrot.lane.b32.xlu1 %v2565_v13, %s2462_s23 }
 0x270   :  { %710 = vrot.lane.b32.xlu1 %v2565_v13, %s2466_s2 }
 0x274   :  { %953 = vrot.lane.b32.xlu1 %v2550_v12, %s2469_s9 }
 0x298   :  { %795 = vmax.xlane.f32.xlu1 %v794_v40 }
 0x2e8   :  { %v793_v41 = vpop.xlane.xlu1 %792 }
 0x2e9   :  { %v813_v42 = vsub.f32 %v308_v32, %v793_v41 }
 0x2eb   :  { %v822_v43 = vmul.f32 1.442695, %v813_v42 }
 0x2ec   :  { %v549_v44 = vpop.permute.xlu1 %548 }
 0x2ed   :  { %2352 = vpow2.f32 %v822_v43  ;;  %2234 = vmatmul.mubr.msk.f32.vlgmr.msra.gmra.mrb[6].mxu1 %vm152_vm2, %v549_v44 }
 0x2ee   :  { %2243 = vmatprep.mubr.msk.f32.mxu1 %vm2461_vm1, %v2460_v8 }
 0x2f0   :  { %v711_v45 = vpop.permute.xlu1 %710 }
 0x2f1   :  { %2242 = vmatpush3.xpose.msk.msra.mxu1 %vm152_vm2, %v711_v45 }
 0x2f2   :  { %2251 = vmatprep.subr.mxu1 %v2460_v8 }
 0x2f4   :  { %v954_v48 = vpop.permute.xlu1 %953 }
 0x2f7   :  { %v2353_v46 = vpop.eup %2352 }
 0x2f8   :  { %v839_v47 = vsel %vm152_vm2, %v2353_v46, 0.0 }
 0x2f9   :  { %840 = vadd.xlane.f32.xlu0 %v839_v47 }
 0x30f   :  { %708 = vrot.lane.b32.xlu0 %v2565_v13, %s2468_s28 }
 0x325   :  { %v796_v49 = vpop.xlane.xlu1 %795 }
 0x326   :  { %v814_v50 = vsub.f32 %v388_v39, %v796_v49 }
 0x328   :  { %v824_v51 = vmul.f32 1.442695, %v814_v50 }
 0x32a   :  { %2354 = vpow2.f32 %v824_v51 }
 0x32e   :  { %789 = vmax.xlane.f32.xlu0 %v788_v52  ;;  %v2701_v52 = vld [vmem:[%s2787_s3 + $0x10] sm:$0xff] }
 0x332   :  { %798 = vmax.xlane.f32.xlu0 %v797_v53 }
 0x334   :  { %v2618_v54 = vpop.eup %2354 }
 0x335   :  { %v842_v55 = vsel %vm152_vm2, %v2618_v54, 0.0 }
 0x336   :  { %843 = vadd.xlane.f32.xlu1 %v842_v55 }
 0x347   :  { %470 = vrot.lane.b32.xlu1 %v2565_v13, %s2463_s24 }
 0x34b   :  { %628 = vrot.lane.b32.xlu1 %v2565_v13, %s2467_s27 }
 0x34f   :  { %876 = vrot.lane.b32.xlu1 %v2550_v12, %s2470_s10 }
 0x353   :  { %1327 = vrot.lane.b32.xlu1 %v2550_v12, %s2471_s11 }
 0x386   :  { %v841_v56 = vpop.xlane.xlu0 %840 }
 0x387   :  { %2356 = vrcp.f32 %v841_v56 }
 0x38a   :  { %v709_v57 = vpop.permute.xlu0 %708 }
 0x38b   :  { %2244 = vmatmul.mubr.msk.f32.vlgmr.msra.gmra.mrb[8].mxu1 %vm152_vm2, %v709_v57 }
 0x38c   :  { %2252 = vmatpush3.msra.mxu1 %v954_v48  ;;  %2253 = vmatprep.mubr.msk.f32.mxu1 %vm2461_vm1, %v2460_v8 }
 0x38d   :  { %2261 = vmatprep.subr.mxu1 %v2460_v8 }
 0x391   :  { %v2357_v58 = vpop.eup %2356 }
 0x392   :  { %v863_v59 = vmul.f32 %v2357_v58, %v2353_v46 }
 0x394   :  { %2254 = vmatmul.mubr.msk.f32.vlgmr.msra.gmra.mrb[10].mxu1 %vm152_vm2, %v863_v59 }
 0x395   :  { %2263 = vmatprep.mubr.msk.f32.mxu1 %vm2461_vm1, %v2460_v8  ;;  %2262 = vmatpush3.msra.mxu1 %v952_v36 }
 0x396   :  { %2271 = vmatprep.subr.mxu1 %v2460_v8 }
 0x3bb   :  { %v790_v60 = vpop.xlane.xlu0 %789 }
 0x3bc   :  { %v812_v61 = vsub.f32 %v2594_v26, %v790_v60 }
 0x3be   :  { %v820_v62 = vmul.f32 1.442695, %v812_v61  ;;  %v2712_v61 = vld [vmem:[%s2787_s3 + $0x18] sm:$0xff] }
 0x3bf   :  { %v799_v5 = vpop.xlane.xlu0 %798 }
 0x3c0   :  { %2358 = vpow2.f32 %v820_v62  ;;  %v622_v63 = vpop.f32.mrb[6].mxu1  ;;  %v815_v6 = vsub.f32 %v2597_v37, %v799_v5 }
 0x3c1   :  { %v2235_v0 = vpop.f32.mrb[7].mxu1  ;;  %v626_v11 = vmul.f32 0.35355338, %v622_v63 }
 0x3c2   :  { %v826_v7 = vmul.f32 1.442695, %v815_v6 }
 0x3c3   :  { %v844_v1 = vpop.xlane.xlu1 %843  ;;  %v627_v15 = vadd.f32 %v626_v11, %v2654_v14 }
 0x3c4   :  { %2360 = vpow2.f32 %v826_v7 }
 0x3c5   :  { %v803_v16 = vsel %vm152_vm2, %v627_v15, -inf }
 0x3c7   :  { %v471_v2 = vpop.permute.xlu1 %470 }
 0x3c8   :  { %2227 = vmatpush3.xpose.msk.msra.mxu0 %vm152_vm2, %v471_v2 }
 0x3c9   :  { %2236 = vmatprep.subr.mxu0 %v2460_v8 }
 0x3ca   :  { %v2359_v3 = vpop.eup %2358 }
 0x3cb   :  { %2229 = vmatmul.mubr.msk.f32.vlgmr.msra.gmra.mrb[4].mxu0 %vm152_vm2, %v2565_v13  ;;  %v836_v4 = vsel %vm152_vm2, %v2359_v3, 0.0  ;;  %v629_v18 = vpop.permute.xlu1 %628 }
 0x3cc   :  { %837 = vadd.xlane.f32.xlu0 %v836_v4  ;;  %2238 = vmatprep.mubr.msk.f32.mxu0 %vm2461_vm1, %v2460_v8 }
 0x3ce   :  { %v2361_v9 = vpop.eup %2360 }
 0x3cf   :  { %v845_v10 = vsel %vm152_vm2, %v2361_v9, 0.0  ;;  %v877_v21 = vpop.permute.xlu1 %876 }
 0x3d3   :  { %v1328_v31 = vpop.permute.xlu1 %1327 }
 0x3e2   :  { %630 = vrot.lane.b32.xlu0 %v2565_v13, %s2464_s25 }
 0x401   :  { %846 = vadd.xlane.f32.xlu0 %v845_v10 }
 0x417   :  { %1176 = vrot.lane.b32.xlu0 %v2550_v12, %s2472_s12 }
 0x436   :  { %804 = vmax.xlane.f32.xlu0 %v803_v16 }
 0x44c   :  { %1554 = vrot.lane.b32.xlu0 %v2565_v13, %s2469_s9 }
 0x459   :  { %v838_v17 = vpop.xlane.xlu0 %837 }
 0x45a   :  { %2362 = vrcp.f32 %v838_v17 }
 0x45b   :  { %2364 = vrcp.f32 %v844_v1 }
 0x45d   :  { %v631_v19 = vpop.permute.xlu0 %630 }
 0x45e   :  { %2237 = vmatpush3.xpose.msk.msra.mxu0 %vm152_vm2, %v631_v19  ;;  %v782_v12 = vpop.f32.mrb[8].mxu1 }
 0x45f   :  { %v2245_v20 = vpop.f32.mrb[9].mxu1  ;;  %2246 = vmatprep.subr.mxu0 %v2460_v8  ;;  %v786_v46 = vmul.f32 0.35355338, %v782_v12 }
 0x461   :  { %2239 = vmatmul.mubr.msk.f32.vlgmr.msra.gmra.mrb[6].mxu0 %vm152_vm2, %v629_v18  ;;  %v787_v51 = vadd.f32 %v786_v46, %v2654_v14 }
 0x462   :  { %2247 = vmatpush3.msra.mxu0 %v877_v21  ;;  %2248 = vmatprep.mubr.msk.f32.mxu0 %vm2461_vm1, %v2460_v8 }
 0x463   :  { %2256 = vmatprep.subr.mxu0 %v2460_v8  ;;  %v809_v55 = vsel %vm152_vm2, %v787_v51, -inf }
 0x464   :  { %v2363_v22 = vpop.eup %2362 }
 0x465   :  { %v861_v23 = vmul.f32 %v2363_v22, %v2359_v3  ;;  %v2365_v28 = vpop.eup %2364 }
 0x466   :  { %v865_v29 = vmul.f32 %v2365_v28, %v2618_v54  ;;  %v2739_v28 = vld [vmem:[%s2788_s4] ss:$0 sm:$0xff]  ;;  %s2473_s4 = smov [#allocation7]  }
 0x467   :  { %2249 = vmatmul.mubr.msk.f32.vlgmr.msra.gmra.mrb[8].mxu0 %vm152_vm2, %v861_v23  ;;  %v1025_v25 = vpop.f32.mrb[10].mxu1  ;;  %s2092_s1 = sshll.u32 %s2473_s4, 4  ;;  %s2093_s1 = int_to_ptr.vmem [resolvable:$true] %s2092_s1 }
 0x468   :  { %v2255_v26 = vpop.f32.mrb[11].mxu1  ;;  %2257 = vmatpush3.msra.mxu0 %v2669_v24  ;;  %2258 = vmatprep.mubr.msk.f32.mxu0 %vm2461_vm1, %v2460_v8  ;;  %s2428_s22 = scalar_lea.vmem %s2093_s1, 256  ;;  %p2433_p3 = scmp.lt.s32.totalorder %s2093_s1, %s2093_s1 }
 0x469   :  { %2266 = vmatprep.subr.mxu0 %v2460_v8  ;;  %p2429_p2 = scmp.ne.s32.totalorder %s2093_s1, %s2428_s22  ;;  %p2434_p4 = scmp.lt.s32.totalorder %s2428_s22, %s2428_s22 }
 0x46b   :  { %2259 = vmatmul.mubr.msk.f32.vlgmr.msra.gmra.mrb[10].mxu0 %vm152_vm2, %v1025_v25  ;;  %p2435_p5 = por %p2434_p4, %p2433_p3 }
 0x46c   :  { %2268 = vmatprep.mubr.msk.f32.mxu0 %vm2461_vm1, %v2460_v8 }
 0x46d   :  { %p2436_p6 = pnand %p2435_p5, %p2429_p2 }
 0x48e   :  { %v847_v27 = vpop.xlane.xlu0 %846 }
 0x48f   :  { %2366 = vrcp.f32 %v847_v27 }
 0x492   :  { %v1177_v30 = vpop.permute.xlu0 %1176 }
 0x493   :  { %2267 = vmatpush3.msra.mxu0 %v1177_v30 }
 0x494   :  { %2269 = vmatmul.mubr.msk.f32.vlgmr.msra.gmra.mrb[12].mxu0 %vm152_vm2, %v865_v29  ;;  %2276 = vmatprep.subr.mxu0 %v2460_v8 }
 0x495   :  { %2277 = vmatpush3.msra.mxu0 %v1328_v31  ;;  %2278 = vmatprep.mubr.msk.f32.mxu0 %vm2461_vm1, %v2460_v8 }
 0x496   :  { %2286 = vmatprep.subr.mxu0 %v2460_v8 }
 0x499   :  { %v2367_v32 = vpop.eup %2366 }
 0x49a   :  { %v867_v33 = vmul.f32 %v2367_v32, %v2361_v9 }
 0x49c   :  { %2279 = vmatmul.mubr.msk.f32.vlgmr.msra.gmra.mrb[14].mxu0 %vm152_vm2, %v867_v33 }
 0x49d   :  { %2288 = vmatprep.mubr.msk.f32.mxu0 %vm2461_vm1, %v2460_v8 }
 0x49e   :  { %v542_v34 = vpop.f32.mrb[4].mxu0 }
 0x49f   :  { %v2230_v35 = vpop.f32.mrb[5].mxu0  ;;  %v546_v40 = vmul.f32 0.35355338, %v542_v34 }
 0x4a1   :  { %v547_v43 = vadd.f32 %v546_v40, %v2654_v14 }
 0x4a3   :  { %v800_v44 = vsel %vm152_vm2, %v547_v43, -inf }
 0x4c3   :  { %v805_v37 = vpop.xlane.xlu0 %804 }
 0x4c4   :  { %v817_v38 = vsub.f32 %v627_v15, %v805_v37 }
 0x4c6   :  { %v830_v39 = vmul.f32 1.442695, %v817_v38 }
 0x4c7   :  { %v1555_v3 = vpop.permute.xlu0 %1554 }
 0x4c8   :  { %2368 = vpow2.f32 %v830_v39 }
 0x4d2   :  { %v2369_v41 = vpop.eup %2368 }
 0x4d3   :  { %v851_v42 = vsel %vm152_vm2, %v2369_v41, 0.0 }
 0x4d4   :  { %852 = vadd.xlane.f32.xlu1 %v851_v42 }
 0x4d8   :  { %801 = vmax.xlane.f32.xlu1 %v800_v44 }
 0x534   :  { %v702_v45 = vpop.f32.mrb[6].mxu0 }
 0x535   :  { %v706_v47 = vmul.f32 0.35355338, %v702_v45  ;;  %v2240_v48 = vpop.f32.mrb[7].mxu0 }
 0x537   :  { %v707_v49 = vadd.f32 %v706_v47, %v2654_v14 }
 0x539   :  { %v806_v50 = vsel %vm152_vm2, %v707_v49, -inf }
 0x53a   :  { %v948_v53 = vpop.f32.mrb[8].mxu0  ;;  %807 = vmax.xlane.f32.xlu1 %v806_v50 }
 0x53b   :  { %v2250_v54 = vpop.f32.mrb[9].mxu0  ;;  %2264 = vmatmul.mubr.msk.f32.vlgmr.msra.gmra.mrb[12].mxu1 %vm152_vm2, %v948_v53 }
 0x53c   :  { %2272 = vmatpush3.msra.mxu1 %v2701_v52  ;;  %2273 = vmatprep.mubr.msk.f32.mxu1 %vm2461_vm1, %v2460_v8 }
 0x53d   :  { %2281 = vmatprep.subr.mxu1 %v2460_v8 }
 0x53e   :  { %v1099_v56 = vpop.f32.mrb[10].mxu0  ;;  %810 = vmax.xlane.f32.xlu1 %v809_v55 }
 0x53f   :  { %v2260_v57 = vpop.f32.mrb[11].mxu0 }
 0x561   :  { %v853_v58 = vpop.xlane.xlu1 %852 }
 0x562   :  { %2370 = vrcp.f32 %v853_v58 }
 0x565   :  { %v802_v59 = vpop.xlane.xlu1 %801 }
 0x566   :  { %v816_v60 = vsub.f32 %v547_v43, %v802_v59 }
 0x567   :  { %v1248_v62 = vpop.f32.mrb[12].mxu0 }
 0x568   :  { %v828_v63 = vmul.f32 1.442695, %v816_v60  ;;  %v2270_v0 = vpop.f32.mrb[13].mxu0  ;;  %2274 = vmatmul.mubr.msk.f32.vlgmr.msra.gmra.mrb[14].mxu1 %vm152_vm2, %v1248_v62 }
 0x569   :  { %2282 = vmatpush3.msra.mxu1 %v2712_v61  ;;  %2283 = vmatprep.mubr.msk.f32.mxu1 %vm2461_vm1, %v2460_v8 }
 0x56a   :  { %2372 = vpow2.f32 %v828_v63  ;;  %2291 = vmatprep.subr.mxu1 %v2460_v8 }
 0x56c   :  { %v2371_v1 = vpop.eup %2370 }
 0x56d   :  { %v871_v5 = vmul.f32 %v2371_v1, %v2369_v41 }
 0x56f   :  { %v1399_v2 = vpop.f32.mrb[14].mxu0 }
 0x570   :  { %v2280_v4 = vpop.f32.mrb[15].mxu0  ;;  %2284 = vmatmul.mubr.msk.f32.vlgmr.msra.gmra.mrb[16].mxu1 %vm152_vm2, %v1399_v2 }
 0x571   :  { %2292 = vmatpush3.msra.mxu1 %v1555_v3  ;;  %2293 = vmatprep.mubr.msk.f32.mxu1 %vm2461_vm1, %v2460_v8 }
 0x572   :  { %2301 = vmatprep.subr.mxu1 %v2460_v8 }
 0x574   :  { %v2373_v6 = vpop.eup %2372  ;;  %2294 = vmatmul.mubr.msk.f32.vlgmr.msra.gmra.mrb[18].mxu1 %vm152_vm2, %v871_v5 }
 0x575   :  { %v848_v7 = vsel %vm152_vm2, %v2373_v6, 0.0  ;;  %2302 = vmatpush3.msra.mxu1 %v952_v36  ;;  %2303 = vmatprep.mubr.msk.f32.mxu1 %vm2461_vm1, %v2460_v8 }
 0x576   :  { %849 = vadd.xlane.f32.xlu1 %v848_v7  ;;  %2311 = vmatprep.subr.mxu1 %v2460_v8 }
 0x5c7   :  { %v808_v9 = vpop.xlane.xlu1 %807 }
 0x5c8   :  { %v818_v10 = vsub.f32 %v707_v49, %v808_v9 }
 0x5ca   :  { %v832_v11 = vmul.f32 1.442695, %v818_v10 }
 0x5cb   :  { %v811_v14 = vpop.xlane.xlu1 %810 }
 0x5cc   :  { %2374 = vpow2.f32 %v832_v11  ;;  %v819_v15 = vsub.f32 %v787_v51, %v811_v14 }
 0x5ce   :  { %v834_v16 = vmul.f32 1.442695, %v819_v15 }
 0x5d0   :  { %2376 = vpow2.f32 %v834_v16 }
 0x5d6   :  { %v2375_v17 = vpop.eup %2374 }
 0x5d7   :  { %v854_v18 = vsel %vm152_vm2, %v2375_v17, 0.0 }
 0x5d8   :  { %855 = vadd.xlane.f32.xlu1 %v854_v18 }
 0x5da   :  { %v2377_v19 = vpop.eup %2376 }
 0x5db   :  { %v857_v12 = vsel %vm152_vm2, %v2377_v19, 0.0 }
 0x5dc   :  { %858 = vadd.xlane.f32.xlu0 %v857_v12 }
 0x5e9   :  { %1478 = vrot.lane.b32.xlu1 %v2565_v13, %s2470_s10 }
 0x5ed   :  { %1776 = vrot.lane.b32.xlu1 %v2565_v13, %s2472_s12 }
 0x5f1   :  { %1926 = vrot.lane.b32.xlu1 %v2565_v13, %s2471_s11 }
 0x603   :  { %v850_v33 = vpop.xlane.xlu1 %849 }
 0x604   :  { %2378 = vrcp.f32 %v850_v33 }
 0x60e   :  { %v1172_v20 = vpop.f32.mrb[12].mxu1  ;;  %v2379_v35 = vpop.eup %2378 }
 0x60f   :  { %v1173_v21 = vadd.f32 %v1172_v20, %v1099_v56  ;;  %v2265_v22 = vpop.f32.mrb[13].mxu1  ;;  %v869_v36 = vmul.f32 %v2379_v35, %v2373_v6 }
 0x63b   :  { %v1322_v23 = vpop.f32.mrb[14].mxu1 }
 0x63c   :  { %v1326_v25 = vadd.f32 %v1322_v23, %v1173_v21  ;;  %v2275_v26 = vpop.f32.mrb[15].mxu1 }
 0x643   :  { %v1473_v27 = vpop.f32.mrb[16].mxu1 }
 0x644   :  { %v1477_v29 = vadd.f32 %v1473_v27, %v1326_v25  ;;  %v2285_v30 = vpop.f32.mrb[17].mxu1 }
 0x646   :  { %v2083_v31 = vadd.f32 %v2739_v28, %v1477_v29 }
 0x647   :  { %v1626_v32 = vpop.f32.mrb[18].mxu1 }
 0x648   :  { %2085 = vst.msk [vmem:[#allocation7] sm:$0xff] %vm65_vm0, %v2083_v31  ;;  %v2295_v13 = vpop.f32.mrb[19].mxu1 }
 0x665   :  { %v856_v34 = vpop.xlane.xlu1 %855 }
 0x666   :  { %2380 = vrcp.f32 %v856_v34 }
 0x669   :  { %v1479_v37 = vpop.permute.xlu1 %1478  ;;  %v859_v38 = vpop.xlane.xlu0 %858 }
 0x66a   :  { %2382 = vrcp.f32 %v859_v38  ;;  %2287 = vmatpush3.msra.mxu0 %v1479_v37 }
 0x66b   :  { %2289 = vmatmul.mubr.msk.f32.vlgmr.msra.gmra.mrb[16].mxu0 %vm152_vm2, %v869_v36  ;;  %2296 = vmatprep.subr.mxu0 %v2460_v8 }
 0x66c   :  { %2297 = vmatpush3.msra.mxu0 %v2669_v24  ;;  %2298 = vmatprep.mubr.msk.f32.mxu0 %vm2461_vm1, %v2460_v8 }
 0x66d   :  { %v1777_v39 = vpop.permute.xlu1 %1776  ;;  %2306 = vmatprep.subr.mxu0 %v2460_v8 }
 0x66f   :  { %2299 = vmatmul.mubr.msk.f32.vlgmr.msra.gmra.mrb[18].mxu0 %vm152_vm2, %v1626_v32 }
 0x670   :  { %v2381_v40 = vpop.eup %2380  ;;  %2307 = vmatpush3.msra.mxu0 %v1777_v39  ;;  %2308 = vmatprep.mubr.msk.f32.mxu0 %vm2461_vm1, %v2460_v8 }
 0x671   :  { %v873_v41 = vmul.f32 %v2381_v40, %v2375_v17  ;;  %v1927_v42 = vpop.permute.xlu1 %1926  ;;  %2316 = vmatprep.subr.mxu0 %v2460_v8 }
 0x673   :  { %2309 = vmatmul.mubr.msk.f32.vlgmr.msra.gmra.mrb[20].mxu0 %vm152_vm2, %v873_v41 }
 0x674   :  { %v2383_v24 = vpop.eup %2382  ;;  %2317 = vmatpush3.msra.mxu0 %v1927_v42  ;;  %2318 = vmatprep.mubr.msk.f32.mxu0 %vm2461_vm1, %v2460_v8 }
 0x675   :  { %v875_v43 = vmul.f32 %v2383_v24, %v2377_v19 }
 0x677   :  { %2319 = vmatmul.mubr.msk.f32.vlgmr.msra.gmra.mrb[22].mxu0 %vm152_vm2, %v875_v43 }
 0x73e   :  { %v1550_v44 = vpop.f32.mrb[16].mxu0 }
 0x73f   :  { %v2290_v45 = vpop.f32.mrb[17].mxu0  ;;  %2304 = vmatmul.mubr.msk.f32.vlgmr.msra.gmra.mrb[20].mxu1 %vm152_vm2, %v1550_v44 }
 0x740   :  { %2312 = vmatpush3.msra.mxu1 %v2701_v52  ;;  %2313 = vmatprep.mubr.msk.f32.mxu1 %vm2461_vm1, %v2460_v8 }
 0x741   :  { %2321 = vmatprep.subr.mxu1 %v2460_v8 }
 0x742   :  { %v1699_v46 = vpop.f32.mrb[18].mxu0 }
 0x743   :  { %v2300_v47 = vpop.f32.mrb[19].mxu0 }
 0x746   :  { %v1848_v48 = vpop.f32.mrb[20].mxu0 }
 0x747   :  { %v2310_v49 = vpop.f32.mrb[21].mxu0  ;;  %2314 = vmatmul.mubr.msk.f32.vlgmr.msra.gmra.mrb[22].mxu1 %vm152_vm2, %v1848_v48 }
 0x748   :  { %2322 = vmatpush3.msra.mxu1 %v2712_v61  ;;  %2323 = vmatprep.mubr.msk.f32.mxu1 %vm2461_vm1, %v2460_v8 }
 0x74a   :  { %v1998_v50 = vpop.f32.mrb[22].mxu0 }
 0x74b   :  { %v2320_v51 = vpop.f32.mrb[23].mxu0  ;;  %2324 = vmatmul.mubr.msk.f32.vlgmr.msra.gmra.mrb[24].mxu1 %vm152_vm2, %v1998_v50 }
 0x812   :  { %v1772_v52 = vpop.f32.mrb[20].mxu1 }
 0x813   :  { %v1773_v53 = vadd.f32 %v1772_v52, %v1699_v46  ;;  %v2305_v54 = vpop.f32.mrb[21].mxu1 }
 0x81a   :  { %v1921_v55 = vpop.f32.mrb[22].mxu1 }
 0x81b   :  { %v1925_v56 = vadd.f32 %v1921_v55, %v1773_v53  ;;  %v2315_v57 = vpop.f32.mrb[23].mxu1 }
 0x81e   :  { %v2071_v58 = vpop.f32.mrb[24].mxu1 }
 0x81f   :  { %v2075_v59 = vadd.f32 %v2071_v58, %v1925_v56  ;;  %v2325_v60 = vpop.f32.mrb[25].mxu1 }
 0x821   :  { %v2084_v61 = vadd.f32 %v2739_v28, %v2075_v59 }
 0x823   :  { %2086 = vst.msk [vmem:[#allocation7 + $0x8] sm:$0xff] %vm65_vm0, %v2084_v61 }
 0x824   :  { %2439 = shalt.err (!%p2436_p6)
}
 0x825   :  { %s2440_s25 = scalar_lea.hbm %s2790_s6, 256 }
 0x826   :  { %p2441_p7 = scmp.ne.s32.totalorder %s2790_s6, %s2440_s25  ;;  %p2444_p8 = scmp.lt.u32.totalorder %s2440_s25, %s2790_s6 }
 0x828   :  { %p2446_p9 = pnand %p2444_p8, %p2441_p7 }
 0x82a   :  { %2449 = shalt.err (!%p2446_p9)
}
 0x82b   :  { %2098 = dma.vmem_to_hbm [thread:$0]  %s2093_s1, 256, %s2790_s6, [#allocation4], %s2457_s7, %s2457_s7, %s2458_s8  }
 0x82c   :  { %2454 = dma.done.wait [#allocation4], 256  }
 0x82d   :  { %2455 = vsyncadd [#allocation4], 4294967040 }
 0x82e   :  { %2102 = vsyncpa [#allocation3], 1 }
 0x82f   :  { %2103 = vsyncpa [#allocation6], 1 }
 0x830   :  { %2104 = vsyncpa [#allocation4], 1 }

</bundles_post_ra>
